<compile_context>
chip_gen: v6e
topology: v6e:2x2x1
jax: 0.10.0
libtpu: 0.0.40
codegen_flags: <defaults>
</compile_context>

<pallas_src>
import functools

import numpy as np
import jax
import jax.numpy as jnp
from jax.experimental import pallas as pl
from jax.experimental.pallas import tpu as pltpu


# ---------------------------------------------------------------------------
# Reference (pure JAX) — used by the first-call self-check and the demo.
# ---------------------------------------------------------------------------

def _pixel_shuffle_ref(x, r):
    B, c_in, H, W = x.shape
    c_out = c_in // (r * r)
    y = x.reshape(B, c_out, r, r, H, W)
    y = jnp.transpose(y, (0, 1, 4, 2, 5, 3))
    return y.reshape(B, c_out, H * r, W * r)


# ---------------------------------------------------------------------------
# Kernels
# ---------------------------------------------------------------------------

def _shuffle_relayout_kernel(x_ref, o_ref, *, r, c_blk):
    """Pure-relayout pixel shuffle (no MXU, no casts, exact for any dtype).

    x_ref: (1, c_blk*r*r, h_t, W)   input channel group / row tile
    o_ref: (1, c_blk, h_t, r*r*W)   row interleave handled by the output view
    """
    h_t, W = x_ref.shape[2], x_ref.shape[3]
    wr = W * r

    def per_channel(c, carry):
        base = c * (r * r)
        for i in range(r):                              # row phase (static, tiny)
            planes = [x_ref[0, base + i * r + j] for j in range(r)]   # (h_t, W)
            # Column interleave: stack along a new minor axis and merge the two
            # minor dims -> XLU lane interleave; slab[h, w*r + j] = planes[j][h, w].
            slab = jnp.stack(planes, axis=-1).reshape(h_t, wr)
            # One contiguous (h_t, W*r) store per (channel, row phase); unmasked
            # whenever W*r is a multiple of 128 (the case where it matters).
            o_ref[0, c, :, i * wr:(i + 1) * wr] = slab
        return carry

    jax.lax.fori_loop(0, c_blk, per_channel, 0, unroll=min(2, c_blk))


def _shuffle_matmul_kernel(x_ref, q_ref, o_ref, *, r, c_blk, mm_dtype):
    """Fallback: column interleave via 0/1 selection matmuls (proven lowering).

    Only used when the pure-relayout kernel fails to lower / verify on the
    current backend.
    TODO(synk): integer inputs through this fallback are exact only for
    |x| <= 2**24 (f32 MXU round trip).
    """
    h_t, W = x_ref.shape[2], x_ref.shape[3]
    wr = W * r
    qs = [q_ref[j] for j in range(r)]           # hoisted: loaded once per block
    for c in range(c_blk):                      # static unroll; c_blk capped at 16
        base = c * (r * r)
        for i in range(r):
            res = jnp.dot(x_ref[0, base + i * r].astype(mm_dtype), qs[0],
                          preferred_element_type=jnp.float32)
            for j in range(1, r):
                res = res + jnp.dot(x_ref[0, base + i * r + j].astype(mm_dtype),
                                    qs[j], preferred_element_type=jnp.float32)
            o_ref[0, c, :, i * wr:(i + 1) * wr] = res.astype(o_ref.dtype)


# ---------------------------------------------------------------------------
# Tiling / VMEM budgeting
# ---------------------------------------------------------------------------

def _largest_divisor_leq(n, cap):
    cap = max(1, min(n, cap))
    best = 1
    for d in range(1, cap + 1):
        if n % d == 0:
            best = d
    return best


def _sublane_multiple(dtype):
    # Packed dtypes tile sublanes in pairs/quads: 8 for 4-byte, 16 for 2-byte,
    # 32 for 1-byte elements.
    return max(8, 32 // jnp.dtype(dtype).itemsize)


def _vmem_capacity_bytes():
    try:
        return int(pltpu.get_tpu_info().vmem_capacity_bytes)
    except Exception:
        return 64 << 20                 # conservative: v7x per-core VMEM


_SLAB_CAP = 64 * 1024                   # per-(channel, row-phase) live-slab cap


def _choose_tiles(B, c_out, H, W, r, dtype, budget, c_cap=None):
    """Pick (c_blk, h_t) so one grid step moves ~`budget` bytes (in + out)."""
    itemsize = jnp.dtype(dtype).itemsize
    sub = _sublane_multiple(dtype)
    h_cands = sorted({d for d in range(1, H + 1)
                      if H % d == 0 and (d % sub == 0 or d == H)})

    # Bound the in-register slab (h_t, W*r) and fit one channel in the budget.
    fit = [h for h in h_cands
           if h * W * r * itemsize <= _SLAB_CAP
           and 2 * r * r * h * W * itemsize <= budget]
    h_t = fit[-1] if fit else h_cands[0]

    # Grow the channel group to fill the per-step budget.
    per_chan = 2 * r * r * h_t * W * itemsize
    cap = max(1, budget // max(1, per_chan))
    if c_cap is not None:
        cap = min(cap, c_cap)
    c_blk = _largest_divisor_leq(c_out, cap)

    # Keep >= 2 grid steps when possible (two v7x TensorCores); prefer splitting
    # rows so blocks stay lane-dense and both cores get balanced work.
    if B * (c_out // c_blk) * (H // h_t) == 1:
        smaller_h = [h for h in h_cands if h < h_t]
        if smaller_h:
            h_t = smaller_h[-1]
        elif c_out > 1:
            c_blk = _largest_divisor_leq(c_out, c_out - 1)
    return c_blk, h_t


# ---------------------------------------------------------------------------
# pallas_call builders
# ---------------------------------------------------------------------------

def _call_relayout(x, r, c_out, budget, vmem_cap):
    B, _, H, W = x.shape
    c_blk, h_t = _choose_tiles(B, c_out, H, W, r, x.dtype, budget)
    itemsize = jnp.dtype(x.dtype).itemsize
    block_bytes = 2 * c_blk * r * r * h_t * W * itemsize
    vmem_limit = min(vmem_cap * 3 // 4,
                     max(32 << 20, 4 * block_bytes + (8 << 20)))
    kernel = functools.partial(_shuffle_relayout_kernel, r=r, c_blk=c_blk)
    return pl.pallas_call(
        kernel,
        out_shape=jax.ShapeDtypeStruct((B, c_out, H, r * r * W), x.dtype),
        grid_spec=pltpu.PrefetchScalarGridSpec(
            num_scalar_prefetch=0,
            grid=(B, c_out // c_blk, H // h_t),
            in_specs=[pl.BlockSpec((1, c_blk * r * r, h_t, W),
                                   lambda b, g, t: (b, g, t, 0))],
            out_specs=pl.BlockSpec((1, c_blk, h_t, r * r * W),
                                   lambda b, g, t: (b, g, t, 0)),
        ),
        compiler_params=pltpu.CompilerParams(
            dimension_semantics=("parallel", "parallel", "parallel"),
            vmem_limit_bytes=int(vmem_limit)),
    )(x)


def _column_interleave_matrices(r, W, dtype):
    """Q[j, w, w*r + j] = 1; per row-phase: res = sum_j plane_j @ Q[j]."""
    q = np.zeros((r, W, W * r), np.float32)
    w = np.arange(W)
    for j in range(r):
        q[j, w, w * r + j] = 1.0
    return jnp.asarray(q, dtype=dtype)


def _call_matmul(x, r, c_out, budget, vmem_cap):
    B, _, H, W = x.shape
    mm_dtype = x.dtype if x.dtype in (jnp.float32, jnp.bfloat16) else jnp.float32
    q_bytes = r * W * W * r * jnp.dtype(mm_dtype).itemsize
    budget_m = max(1 << 20, budget - 2 * q_bytes)       # account double-buffered Q
    c_blk, h_t = _choose_tiles(B, c_out, H, W, r, x.dtype, budget_m, c_cap=16)
    itemsize = jnp.dtype(x.dtype).itemsize
    block_bytes = 2 * c_blk * r * r * h_t * W * itemsize
    vmem_limit = min(vmem_cap * 3 // 4,
                     max(32 << 20, 4 * block_bytes + 2 * q_bytes + (8 << 20)))
    q = _column_interleave_matrices(r, W, mm_dtype)
    kernel = functools.partial(_shuffle_matmul_kernel, r=r, c_blk=c_blk,
                               mm_dtype=mm_dtype)
    return pl.pallas_call(
        kernel,
        out_shape=jax.ShapeDtypeStruct((B, c_out, H, r * r * W), x.dtype),
        grid_spec=pltpu.PrefetchScalarGridSpec(
            num_scalar_prefetch=0,
            grid=(B, c_out // c_blk, H // h_t),
            in_specs=[pl.BlockSpec((1, c_blk * r * r, h_t, W),
                                   lambda b, g, t: (b, g, t, 0)),
                      pl.BlockSpec((r, W, W * r), lambda b, g, t: (0, 0, 0))],
            out_specs=pl.BlockSpec((1, c_blk, h_t, r * r * W),
                                   lambda b, g, t: (b, g, t, 0)),
        ),
        compiler_params=pltpu.CompilerParams(
            dimension_semantics=("parallel", "parallel", "parallel"),
            vmem_limit_bytes=int(vmem_limit)),
    )(x, q)


# ---------------------------------------------------------------------------
# Public wrapper
# ---------------------------------------------------------------------------

_RELAYOUT_OK = None     # one-time capability probe: None=unknown, True/False


def pixel_shuffle_pallas(x, scale=2):
    """Pallas TPU implementation of nn.PixelShuffle(scale) on NCHW input."""
    global _RELAYOUT_OK
    B, c_in, H, W = x.shape
    r = int(scale)
    assert c_in % (r * r) == 0, "channels must be divisible by scale**2"
    c_out = c_in // (r * r)
    if r == 1:
        return x

    vmem_cap = _vmem_capacity_bytes()
    # Per-grid-step (input+output) byte budget; the pipeline double-buffers it.
    budget = max(1 << 20, vmem_cap // 16)

    out_view = None
    if _RELAYOUT_OK is None:
        # First (eager) call probes the pure-relayout kernel and self-checks it
        # against the pure-JAX reference; on failure we fall back once to the
        # proven selection-matmul kernel and remember the choice.
        try:
            cand = _call_relayout(x, r, c_out, budget, vmem_cap)
            jax.block_until_ready(cand)
            ok = bool(jnp.array_equal(
                cand.reshape(B, c_out, H * r, W * r),
                _pixel_shuffle_ref(x, r), equal_nan=True))
            _RELAYOUT_OK = ok
            if ok:
                out_view = cand
        except Exception:
            _RELAYOUT_OK = False
            out_view = None
    elif _RELAYOUT_OK:
        out_view = _call_relayout(x, r, c_out, budget, vmem_cap)
    if out_view is None:
        out_view = _call_matmul(x, r, c_out, budget, vmem_cap)

    # Contiguous (metadata-only) reshape: (B, C, H, r*r*W) -> (B, C, H*r, W*r).
    return out_view.reshape(B, c_out, H * r, W * r)


class PixelShuffleModule:
    """Mirrors the PyTorch `pixel_shuffle` module semantics."""

    def __init__(self, scale=2, transi_learn=False):
        self.scale = scale
        self.transi_learn = transi_learn

    def __call__(self, x):
        if self.transi_learn:
            x = dict(x)
            x["value"] = pixel_shuffle_pallas(x["value"], self.scale)
            return x
        return pixel_shuffle_pallas(x, self.scale)


if __name__ == "__main__":
    key = jax.random.PRNGKey(0)
    # scale=2: input (B, C*r^2, H, W) = (2, 16, 8, 8) -> output (2, 4, 16, 16)
    x = jax.random.normal(key, (2, 16, 8, 8), dtype=jnp.float32)

    mod = PixelShuffleModule(scale=2, transi_learn=False)
    out = jax.block_until_ready(mod(x))

    ref = _pixel_shuffle_ref(x, 2)
    assert out.shape == (2, 4, 16, 16), out.shape
    assert out.dtype == x.dtype
    assert jnp.allclose(out, ref, atol=1e-5, rtol=1e-5), "mismatch vs reference"

    # transi_learn dict path (same semantics as the PyTorch module).
    mod_d = PixelShuffleModule(scale=2, transi_learn=True)
    out_d = jax.block_until_ready(mod_d({"value": x})["value"])
    assert jnp.allclose(out_d, ref, atol=1e-5, rtol=1e-5), "dict path mismatch"

    print("KERNEL_OK")
</pallas_src>

<mosaic_0001>
module attributes {stable_mosaic.version = 11 : i64} {
  func.func @_shuffle_matmul_kernel(%arg0: i32, %arg1: i32, %arg2: i32, %arg3: memref<1x16x8x8xf32, #tpu.memory_space<vmem>>, %arg4: memref<2x8x16xf32, #tpu.memory_space<vmem>>, %arg5: memref<1x4x8x32xf32, #tpu.memory_space<vmem>>) attributes {dimension_semantics = [#tpu.dimension_semantics<parallel>, #tpu.dimension_semantics<parallel>, #tpu.dimension_semantics<parallel>], iteration_bounds = array<i64: 2, 1, 1>, scalar_prefetch = 0 : i64, scratch_operands = 0 : i64, tpu.core_type = #tpu.core_type<tc>, window_params = [{transform_indices = @transform_0, window_bounds = array<i64: 1, 16, 8, 8>}, {pipeline_mode = #tpu.pipeline_mode<synchronous>, transform_indices = @transform_1, window_bounds = array<i64: 2, 8, 16>}, {transform_indices = @transform_2, window_bounds = array<i64: 1, 4, 8, 32>}]} {
    %c0 = arith.constant 0 : index
    %c0_0 = arith.constant 0 : index
    %c0_1 = arith.constant 0 : index
    %0 = vector.load %arg4[%c0, %c0_0, %c0_1] : memref<2x8x16xf32, #tpu.memory_space<vmem>>, vector<1x8x16xf32>
    %1 = vector.shape_cast %0 : vector<1x8x16xf32> to vector<8x16xf32>
    %c1 = arith.constant 1 : index
    %c0_2 = arith.constant 0 : index
    %c0_3 = arith.constant 0 : index
    %2 = vector.load %arg4[%c1, %c0_2, %c0_3] : memref<2x8x16xf32, #tpu.memory_space<vmem>>, vector<1x8x16xf32>
    %3 = vector.shape_cast %2 : vector<1x8x16xf32> to vector<8x16xf32>
    %c0_4 = arith.constant 0 : index
    %c0_5 = arith.constant 0 : index
    %c0_6 = arith.constant 0 : index
    %c0_7 = arith.constant 0 : index
    %4 = vector.load %arg3[%c0_4, %c0_5, %c0_6, %c0_7] : memref<1x16x8x8xf32, #tpu.memory_space<vmem>>, vector<1x1x8x8xf32>
    %5 = vector.shape_cast %4 : vector<1x1x8x8xf32> to vector<8x8xf32>
    %cst = arith.constant dense<0.000000e+00> : vector<8x16xf32>
    %6 = tpu.matmul %5, %1, %cst {dimension_numbers = #tpu.dot_dimension_numbers<[1], [0], [0], [1], [0, 0, 1, 1], [], []>} : vector<8x8xf32>, vector<8x16xf32>, vector<8x16xf32> -> vector<8x16xf32>
    %c0_8 = arith.constant 0 : index
    %c1_9 = arith.constant 1 : index
    %c0_10 = arith.constant 0 : index
    %c0_11 = arith.constant 0 : index
    %7 = vector.load %arg3[%c0_8, %c1_9, %c0_10, %c0_11] : memref<1x16x8x8xf32, #tpu.memory_space<vmem>>, vector<1x1x8x8xf32>
    %8 = vector.shape_cast %7 : vector<1x1x8x8xf32> to vector<8x8xf32>
    %cst_12 = arith.constant dense<0.000000e+00> : vector<8x16xf32>
    %9 = tpu.matmul %8, %3, %cst_12 {dimension_numbers = #tpu.dot_dimension_numbers<[1], [0], [0], [1], [0, 0, 1, 1], [], []>} : vector<8x8xf32>, vector<8x16xf32>, vector<8x16xf32> -> vector<8x16xf32>
    %10 = arith.addf %6, %9 : vector<8x16xf32>
    %c0_13 = arith.constant 0 : index
    %c0_14 = arith.constant 0 : index
    %c0_15 = arith.constant 0 : index
    %c0_16 = arith.constant 0 : index
    %11 = vector.load %arg5[%c0_13, %c0_14, %c0_15, %c0_16] : memref<1x4x8x32xf32, #tpu.memory_space<vmem>>, vector<1x1x8x16xf32>
    %12 = vector.shape_cast %11 : vector<1x1x8x16xf32> to vector<8x16xf32>
    %13 = vector.shape_cast %10 : vector<8x16xf32> to vector<1x1x8x16xf32>
    tpu.vector_store %arg5[%c0_13, %c0_14, %c0_15, %c0_16], %13 {strides = array<i32>} : memref<1x4x8x32xf32, #tpu.memory_space<vmem>>, vector<1x1x8x16xf32>,
    %c0_17 = arith.constant 0 : index
    %c2 = arith.constant 2 : index
    %c0_18 = arith.constant 0 : index
    %c0_19 = arith.constant 0 : index
    %14 = vector.load %arg3[%c0_17, %c2, %c0_18, %c0_19] : memref<1x16x8x8xf32, #tpu.memory_space<vmem>>, vector<1x1x8x8xf32>
    %15 = vector.shape_cast %14 : vector<1x1x8x8xf32> to vector<8x8xf32>
    %cst_20 = arith.constant dense<0.000000e+00> : vector<8x16xf32>
    %16 = tpu.matmul %15, %1, %cst_20 {dimension_numbers = #tpu.dot_dimension_numbers<[1], [0], [0], [1], [0, 0, 1, 1], [], []>} : vector<8x8xf32>, vector<8x16xf32>, vector<8x16xf32> -> vector<8x16xf32>
    %c0_21 = arith.constant 0 : index
    %c3 = arith.constant 3 : index
    %c0_22 = arith.constant 0 : index
    %c0_23 = arith.constant 0 : index
    %17 = vector.load %arg3[%c0_21, %c3, %c0_22, %c0_23] : memref<1x16x8x8xf32, #tpu.memory_space<vmem>>, vector<1x1x8x8xf32>
    %18 = vector.shape_cast %17 : vector<1x1x8x8xf32> to vector<8x8xf32>
    %cst_24 = arith.constant dense<0.000000e+00> : vector<8x16xf32>
    %19 = tpu.matmul %18, %3, %cst_24 {dimension_numbers = #tpu.dot_dimension_numbers<[1], [0], [0], [1], [0, 0, 1, 1], [], []>} : vector<8x8xf32>, vector<8x16xf32>, vector<8x16xf32> -> vector<8x16xf32>
    %20 = arith.addf %16, %19 : vector<8x16xf32>
    %c0_25 = arith.constant 0 : index
    %c0_26 = arith.constant 0 : index
    %c0_27 = arith.constant 0 : index
    %c16 = arith.constant 16 : index
    %21 = vector.load %arg5[%c0_25, %c0_26, %c0_27, %c16] : memref<1x4x8x32xf32, #tpu.memory_space<vmem>>, vector<1x1x8x16xf32>
    %22 = vector.shape_cast %21 : vector<1x1x8x16xf32> to vector<8x16xf32>
    %23 = vector.shape_cast %20 : vector<8x16xf32> to vector<1x1x8x16xf32>
    tpu.vector_store %arg5[%c0_25, %c0_26, %c0_27, %c16], %23 {strides = array<i32>} : memref<1x4x8x32xf32, #tpu.memory_space<vmem>>, vector<1x1x8x16xf32>,
    %c0_28 = arith.constant 0 : index
    %c4 = arith.constant 4 : index
    %c0_29 = arith.constant 0 : index
    %c0_30 = arith.constant 0 : index
    %24 = vector.load %arg3[%c0_28, %c4, %c0_29, %c0_30] : memref<1x16x8x8xf32, #tpu.memory_space<vmem>>, vector<1x1x8x8xf32>
    %25 = vector.shape_cast %24 : vector<1x1x8x8xf32> to vector<8x8xf32>
    %cst_31 = arith.constant dense<0.000000e+00> : vector<8x16xf32>
    %26 = tpu.matmul %25, %1, %cst_31 {dimension_numbers = #tpu.dot_dimension_numbers<[1], [0], [0], [1], [0, 0, 1, 1], [], []>} : vector<8x8xf32>, vector<8x16xf32>, vector<8x16xf32> -> vector<8x16xf32>
    %c0_32 = arith.constant 0 : index
    %c5 = arith.constant 5 : index
    %c0_33 = arith.constant 0 : index
    %c0_34 = arith.constant 0 : index
    %27 = vector.load %arg3[%c0_32, %c5, %c0_33, %c0_34] : memref<1x16x8x8xf32, #tpu.memory_space<vmem>>, vector<1x1x8x8xf32>
    %28 = vector.shape_cast %27 : vector<1x1x8x8xf32> to vector<8x8xf32>
    %cst_35 = arith.constant dense<0.000000e+00> : vector<8x16xf32>
    %29 = tpu.matmul %28, %3, %cst_35 {dimension_numbers = #tpu.dot_dimension_numbers<[1], [0], [0], [1], [0, 0, 1, 1], [], []>} : vector<8x8xf32>, vector<8x16xf32>, vector<8x16xf32> -> vector<8x16xf32>
    %30 = arith.addf %26, %29 : vector<8x16xf32>
    %c0_36 = arith.constant 0 : index
    %c1_37 = arith.constant 1 : index
    %c0_38 = arith.constant 0 : index
    %c0_39 = arith.constant 0 : index
    %31 = vector.load %arg5[%c0_36, %c1_37, %c0_38, %c0_39] : memref<1x4x8x32xf32, #tpu.memory_space<vmem>>, vector<1x1x8x16xf32>
    %32 = vector.shape_cast %31 : vector<1x1x8x16xf32> to vector<8x16xf32>
    %33 = vector.shape_cast %30 : vector<8x16xf32> to vector<1x1x8x16xf32>
    tpu.vector_store %arg5[%c0_36, %c1_37, %c0_38, %c0_39], %33 {strides = array<i32>} : memref<1x4x8x32xf32, #tpu.memory_space<vmem>>, vector<1x1x8x16xf32>,
    %c0_40 = arith.constant 0 : index
    %c6 = arith.constant 6 : index
    %c0_41 = arith.constant 0 : index
    %c0_42 = arith.constant 0 : index
    %34 = vector.load %arg3[%c0_40, %c6, %c0_41, %c0_42] : memref<1x16x8x8xf32, #tpu.memory_space<vmem>>, vector<1x1x8x8xf32>
    %35 = vector.shape_cast %34 : vector<1x1x8x8xf32> to vector<8x8xf32>
    %cst_43 = arith.constant dense<0.000000e+00> : vector<8x16xf32>
    %36 = tpu.matmul %35, %1, %cst_43 {dimension_numbers = #tpu.dot_dimension_numbers<[1], [0], [0], [1], [0, 0, 1, 1], [], []>} : vector<8x8xf32>, vector<8x16xf32>, vector<8x16xf32> -> vector<8x16xf32>
    %c0_44 = arith.constant 0 : index
    %c7 = arith.constant 7 : index
    %c0_45 = arith.constant 0 : index
    %c0_46 = arith.constant 0 : index
    %37 = vector.load %arg3[%c0_44, %c7, %c0_45, %c0_46] : memref<1x16x8x8xf32, #tpu.memory_space<vmem>>, vector<1x1x8x8xf32>
    %38 = vector.shape_cast %37 : vector<1x1x8x8xf32> to vector<8x8xf32>
    %cst_47 = arith.constant dense<0.000000e+00> : vector<8x16xf32>
    %39 = tpu.matmul %38, %3, %cst_47 {dimension_numbers = #tpu.dot_dimension_numbers<[1], [0], [0], [1], [0, 0, 1, 1], [], []>} : vector<8x8xf32>, vector<8x16xf32>, vector<8x16xf32> -> vector<8x16xf32>
    %40 = arith.addf %36, %39 : vector<8x16xf32>
    %c0_48 = arith.constant 0 : index
    %c1_49 = arith.constant 1 : index
    %c0_50 = arith.constant 0 : index
    %c16_51 = arith.constant 16 : index
    %41 = vector.load %arg5[%c0_48, %c1_49, %c0_50, %c16_51] : memref<1x4x8x32xf32, #tpu.memory_space<vmem>>, vector<1x1x8x16xf32>
    %42 = vector.shape_cast %41 : vector<1x1x8x16xf32> to vector<8x16xf32>
    %43 = vector.shape_cast %40 : vector<8x16xf32> to vector<1x1x8x16xf32>
    tpu.vector_store %arg5[%c0_48, %c1_49, %c0_50, %c16_51], %43 {strides = array<i32>} : memref<1x4x8x32xf32, #tpu.memory_space<vmem>>, vector<1x1x8x16xf32>,
    %c0_52 = arith.constant 0 : index
    %c8 = arith.constant 8 : index
    %c0_53 = arith.constant 0 : index
    %c0_54 = arith.constant 0 : index
    %44 = vector.load %arg3[%c0_52, %c8, %c0_53, %c0_54] : memref<1x16x8x8xf32, #tpu.memory_space<vmem>>, vector<1x1x8x8xf32>
    %45 = vector.shape_cast %44 : vector<1x1x8x8xf32> to vector<8x8xf32>
    %cst_55 = arith.constant dense<0.000000e+00> : vector<8x16xf32>
    %46 = tpu.matmul %45, %1, %cst_55 {dimension_numbers = #tpu.dot_dimension_numbers<[1], [0], [0], [1], [0, 0, 1, 1], [], []>} : vector<8x8xf32>, vector<8x16xf32>, vector<8x16xf32> -> vector<8x16xf32>
    %c0_56 = arith.constant 0 : index
    %c9 = arith.constant 9 : index
    %c0_57 = arith.constant 0 : index
    %c0_58 = arith.constant 0 : index
    %47 = vector.load %arg3[%c0_56, %c9, %c0_57, %c0_58] : memref<1x16x8x8xf32, #tpu.memory_space<vmem>>, vector<1x1x8x8xf32>
    %48 = vector.shape_cast %47 : vector<1x1x8x8xf32> to vector<8x8xf32>
    %cst_59 = arith.constant dense<0.000000e+00> : vector<8x16xf32>
    %49 = tpu.matmul %48, %3, %cst_59 {dimension_numbers = #tpu.dot_dimension_numbers<[1], [0], [0], [1], [0, 0, 1, 1], [], []>} : vector<8x8xf32>, vector<8x16xf32>, vector<8x16xf32> -> vector<8x16xf32>
    %50 = arith.addf %46, %49 : vector<8x16xf32>
    %c0_60 = arith.constant 0 : index
    %c2_61 = arith.constant 2 : index
    %c0_62 = arith.constant 0 : index
    %c0_63 = arith.constant 0 : index
    %51 = vector.load %arg5[%c0_60, %c2_61, %c0_62, %c0_63] : memref<1x4x8x32xf32, #tpu.memory_space<vmem>>, vector<1x1x8x16xf32>
    %52 = vector.shape_cast %51 : vector<1x1x8x16xf32> to vector<8x16xf32>
    %53 = vector.shape_cast %50 : vector<8x16xf32> to vector<1x1x8x16xf32>
    tpu.vector_store %arg5[%c0_60, %c2_61, %c0_62, %c0_63], %53 {strides = array<i32>} : memref<1x4x8x32xf32, #tpu.memory_space<vmem>>, vector<1x1x8x16xf32>,
    %c0_64 = arith.constant 0 : index
    %c10 = arith.constant 10 : index
    %c0_65 = arith.constant 0 : index
    %c0_66 = arith.constant 0 : index
    %54 = vector.load %arg3[%c0_64, %c10, %c0_65, %c0_66] : memref<1x16x8x8xf32, #tpu.memory_space<vmem>>, vector<1x1x8x8xf32>
    %55 = vector.shape_cast %54 : vector<1x1x8x8xf32> to vector<8x8xf32>
    %cst_67 = arith.constant dense<0.000000e+00> : vector<8x16xf32>
    %56 = tpu.matmul %55, %1, %cst_67 {dimension_numbers = #tpu.dot_dimension_numbers<[1], [0], [0], [1], [0, 0, 1, 1], [], []>} : vector<8x8xf32>, vector<8x16xf32>, vector<8x16xf32> -> vector<8x16xf32>
    %c0_68 = arith.constant 0 : index
    %c11 = arith.constant 11 : index
    %c0_69 = arith.constant 0 : index
    %c0_70 = arith.constant 0 : index
    %57 = vector.load %arg3[%c0_68, %c11, %c0_69, %c0_70] : memref<1x16x8x8xf32, #tpu.memory_space<vmem>>, vector<1x1x8x8xf32>
    %58 = vector.shape_cast %57 : vector<1x1x8x8xf32> to vector<8x8xf32>
    %cst_71 = arith.constant dense<0.000000e+00> : vector<8x16xf32>
    %59 = tpu.matmul %58, %3, %cst_71 {dimension_numbers = #tpu.dot_dimension_numbers<[1], [0], [0], [1], [0, 0, 1, 1], [], []>} : vector<8x8xf32>, vector<8x16xf32>, vector<8x16xf32> -> vector<8x16xf32>
    %60 = arith.addf %56, %59 : vector<8x16xf32>
    %c0_72 = arith.constant 0 : index
    %c2_73 = arith.constant 2 : index
    %c0_74 = arith.constant 0 : index
    %c16_75 = arith.constant 16 : index
    %61 = vector.load %arg5[%c0_72, %c2_73, %c0_74, %c16_75] : memref<1x4x8x32xf32, #tpu.memory_space<vmem>>, vector<1x1x8x16xf32>
    %62 = vector.shape_cast %61 : vector<1x1x8x16xf32> to vector<8x16xf32>
    %63 = vector.shape_cast %60 : vector<8x16xf32> to vector<1x1x8x16xf32>
    tpu.vector_store %arg5[%c0_72, %c2_73, %c0_74, %c16_75], %63 {strides = array<i32>} : memref<1x4x8x32xf32, #tpu.memory_space<vmem>>, vector<1x1x8x16xf32>,
    %c0_76 = arith.constant 0 : index
    %c12 = arith.constant 12 : index
    %c0_77 = arith.constant 0 : index
    %c0_78 = arith.constant 0 : index
    %64 = vector.load %arg3[%c0_76, %c12, %c0_77, %c0_78] : memref<1x16x8x8xf32, #tpu.memory_space<vmem>>, vector<1x1x8x8xf32>
    %65 = vector.shape_cast %64 : vector<1x1x8x8xf32> to vector<8x8xf32>
    %cst_79 = arith.constant dense<0.000000e+00> : vector<8x16xf32>
    %66 = tpu.matmul %65, %1, %cst_79 {dimension_numbers = #tpu.dot_dimension_numbers<[1], [0], [0], [1], [0, 0, 1, 1], [], []>} : vector<8x8xf32>, vector<8x16xf32>, vector<8x16xf32> -> vector<8x16xf32>
    %c0_80 = arith.constant 0 : index
    %c13 = arith.constant 13 : index
    %c0_81 = arith.constant 0 : index
    %c0_82 = arith.constant 0 : index
    %67 = vector.load %arg3[%c0_80, %c13, %c0_81, %c0_82] : memref<1x16x8x8xf32, #tpu.memory_space<vmem>>, vector<1x1x8x8xf32>
    %68 = vector.shape_cast %67 : vector<1x1x8x8xf32> to vector<8x8xf32>
    %cst_83 = arith.constant dense<0.000000e+00> : vector<8x16xf32>
    %69 = tpu.matmul %68, %3, %cst_83 {dimension_numbers = #tpu.dot_dimension_numbers<[1], [0], [0], [1], [0, 0, 1, 1], [], []>} : vector<8x8xf32>, vector<8x16xf32>, vector<8x16xf32> -> vector<8x16xf32>
    %70 = arith.addf %66, %69 : vector<8x16xf32>
    %c0_84 = arith.constant 0 : index
    %c3_85 = arith.constant 3 : index
    %c0_86 = arith.constant 0 : index
    %c0_87 = arith.constant 0 : index
    %71 = vector.load %arg5[%c0_84, %c3_85, %c0_86, %c0_87] : memref<1x4x8x32xf32, #tpu.memory_space<vmem>>, vector<1x1x8x16xf32>
    %72 = vector.shape_cast %71 : vector<1x1x8x16xf32> to vector<8x16xf32>
    %73 = vector.shape_cast %70 : vector<8x16xf32> to vector<1x1x8x16xf32>
    tpu.vector_store %arg5[%c0_84, %c3_85, %c0_86, %c0_87], %73 {strides = array<i32>} : memref<1x4x8x32xf32, #tpu.memory_space<vmem>>, vector<1x1x8x16xf32>,
    %c0_88 = arith.constant 0 : index
    %c14 = arith.constant 14 : index
    %c0_89 = arith.constant 0 : index
    %c0_90 = arith.constant 0 : index
    %74 = vector.load %arg3[%c0_88, %c14, %c0_89, %c0_90] : memref<1x16x8x8xf32, #tpu.memory_space<vmem>>, vector<1x1x8x8xf32>
    %75 = vector.shape_cast %74 : vector<1x1x8x8xf32> to vector<8x8xf32>
    %cst_91 = arith.constant dense<0.000000e+00> : vector<8x16xf32>
    %76 = tpu.matmul %75, %1, %cst_91 {dimension_numbers = #tpu.dot_dimension_numbers<[1], [0], [0], [1], [0, 0, 1, 1], [], []>} : vector<8x8xf32>, vector<8x16xf32>, vector<8x16xf32> -> vector<8x16xf32>
    %c0_92 = arith.constant 0 : index
    %c15 = arith.constant 15 : index
    %c0_93 = arith.constant 0 : index
    %c0_94 = arith.constant 0 : index
    %77 = vector.load %arg3[%c0_92, %c15, %c0_93, %c0_94] : memref<1x16x8x8xf32, #tpu.memory_space<vmem>>, vector<1x1x8x8xf32>
    %78 = vector.shape_cast %77 : vector<1x1x8x8xf32> to vector<8x8xf32>
    %cst_95 = arith.constant dense<0.000000e+00> : vector<8x16xf32>
    %79 = tpu.matmul %78, %3, %cst_95 {dimension_numbers = #tpu.dot_dimension_numbers<[1], [0], [0], [1], [0, 0, 1, 1], [], []>} : vector<8x8xf32>, vector<8x16xf32>, vector<8x16xf32> -> vector<8x16xf32>
    %80 = arith.addf %76, %79 : vector<8x16xf32>
    %c0_96 = arith.constant 0 : index
    %c3_97 = arith.constant 3 : index
    %c0_98 = arith.constant 0 : index
    %c16_99 = arith.constant 16 : index
    %81 = vector.load %arg5[%c0_96, %c3_97, %c0_98, %c16_99] : memref<1x4x8x32xf32, #tpu.memory_space<vmem>>, vector<1x1x8x16xf32>
    %82 = vector.shape_cast %81 : vector<1x1x8x16xf32> to vector<8x16xf32>
    %83 = vector.shape_cast %80 : vector<8x16xf32> to vector<1x1x8x16xf32>
    tpu.vector_store %arg5[%c0_96, %c3_97, %c0_98, %c16_99], %83 {strides = array<i32>} : memref<1x4x8x32xf32, #tpu.memory_space<vmem>>, vector<1x1x8x16xf32>,
    return
  }
  func.func @transform_0(%arg0: i32, %arg1: i32, %arg2: i32) -> (i32, i32, i32, i32) {
    %c0_i32 = arith.constant 0 : i32
    %c0_i32_0 = arith.constant 0 : i32
    return %arg0, %arg1, %arg2, %c0_i32 : i32, i32, i32, i32
  }
  func.func @transform_1(%arg0: i32, %arg1: i32, %arg2: i32) -> (i32, i32, i32) {
    %c0_i32 = arith.constant 0 : i32
    %c0_i32_0 = arith.constant 0 : i32
    %c0_i32_1 = arith.constant 0 : i32
    %c0_i32_2 = arith.constant 0 : i32
    return %c0_i32, %c0_i32_0, %c0_i32_1 : i32, i32, i32
  }
  func.func @transform_2(%arg0: i32, %arg1: i32, %arg2: i32) -> (i32, i32, i32, i32) {
    %c0_i32 = arith.constant 0 : i32
    %c0_i32_0 = arith.constant 0 : i32
    return %arg0, %arg1, %arg2, %c0_i32 : i32, i32, i32, i32
  }
}

</mosaic_0001>

<bundles_post_ra>
// kernel: tpu_custom_call.1
= control target key start
LH: loop header
LB: loop body
LE: loop exit
PB: predicated region body
PF: predicated region fallthrough
CT: control target
= control target key end

     0   :  { %7 = vsyncpa [#allocation3], 0  ;;  %s2097_s0 = inlined_call_operand.vmem [shape: f32[2,16,8,8], index: 0, kind: input, shape index: {}]   ;;  %s2098_s1 = inlined_call_operand.vmem [shape: f32[2,8,16], index: 1, kind: input, shape index: {}]   ;;  %s2099_s2 = inlined_call_operand.hbm [shape: f32[2,4,8,32], index: 2, kind: output, shape index: {}]  }
   0x1   :  { %9 = vsyncpa [#allocation3 + $0x1], 0  ;;  %s1852_s9 = smov 0   ;;  %s1854_s10 = smov 0  }
   0x2   :  { %s1856_s11 = smov 0   ;;  %s1858_s12 = smov 0  }
   0x3   :  { %s1860_s13 = smov 0   ;;  %s1862_s14 = smov 0  }
   0x4 LB: > { %s1528_s15 = sadd.s32 4294967295, %s1829_s14   ;;  %s1529_s16 = sadd.s32 4294967294, %s1829_s14   ;;  %s1829_s14 = sphi %s1862_s14, %s15_s14   ;;  %s1825_s13 = sphi %s1860_s13, %s2106_s13   ;;  %s1821_s12 = sphi %s1858_s12, %s2105_s12   ;;  %s1817_s11 = sphi %s1856_s11, %s2104_s11   ;;  %s1813_s10 = sphi %s1854_s10, %s2103_s10   ;;  %s1809_s9 = sphi %s1852_s9, %s2102_s9  }
   0x5   : > { %s34_s17 = sadd.s32 1, %s1825_s13  ;;  %s96_s18 = sadd.s32 1, %s1817_s11 }
   0x6   : > { %p36_p0 = scmp.ge.s32.totalorder %s34_s17, 2  ;;  %p106_p1 = scmp.ne.s32.totalorder %s1817_s11, %s1813_s10 }
   0x7   : > { %p107_p2 = scmp.eq.s32.totalorder %s1528_s15, 1  ;;  %p112_p3 = scmp.ne.s32.totalorder %s1813_s10, %s1809_s9 }
   0x8   : > { %s2108_s17 = smov (%p36_p0, %s34_s17), 0  ;;  %p113_p5 = scmp.eq.s32.totalorder %s1529_s16, 1 }
   0x9   : > { %p1892_p4 = por %p107_p2, %p106_p1  ;;  %s89_s20 = ssub.s32 %s1825_s13, %s2108_s17 }
   0xa   : > { %p1532_p6 = scmp.ge.s32.totalorder %s1829_s14, 1  ;;  %p94_p7 = scmp.eq.s32.totalorder %s89_s20, 0 }
   0xb   : > { %p1899_p8 = por %p113_p5, %p112_p3  ;;  %p150_p9 = scmp.lt.s32.totalorder %s1829_s14, 3 }
   0xc   : > { %s1905_s22 = scalar_select %p94_p7, %s1817_s11, %s96_s18  }
   0xd   : > { %p151_p10 = pnand %p1532_p6, %p150_p9 }
   0xe   : > { %p180_p11 = scmp.lt.s32.totalorder (!%p151_p10), %s1821_s12, 1  ;;  %s176_s4 = sand.u32 (!%p151_p10), 1, %s1813_s10  }
   0xf   : > { %154 = sbr.rel (%p151_p10) target bundleno = 377 (0x179), region = 28  ;;  %s1533_s5 = sshll.u32 (!%p151_p10), %s176_s4, 5 }
  0x10   : > { %s2023_s6 = scalar_lea.vmem (!%p151_p10), [#allocation2], %s1533_s5  ;;  %s1833_s7 = smov (!%p151_p10), 16  }
  0x11   : > { %s1580_s8 = sshll.u32 (!%p151_p10), %s1821_s12, 9  ;;  %s1442_s15 = sshll.u32 (!%p151_p10), %s2023_s6, 4  ;;  %s2047_s15 = int_to_ptr.vmem [resolvable:$true] %s1442_s15 }
  0x12   : > { %s2045_s20 = scalar_lea.hbm (!%p151_p10), %s2099_s2, %s1580_s8  ;;  %s2052_s23 = scalar_lea.sflag (!%p151_p10), [#allocation3], %s176_s4 }
  0x13   : > { %s1753_s24 = scalar_lea.vmem (!%p151_p10), %s2047_s15, 512 }
  0x14   : > { %v1910_v0 = vld [vmem:[%s2098_s1 + $0x8] sm:$0xff]  ;;  %v1915_v1 = vld [vmem:[%s2098_s1] sm:$0xff]  ;;  %v1831_v2 = vmov 0.0   ;;  %s181_s27 = scalar_select %p180_p11, %s1821_s12, 1  ;;  %vm1832_vm0 = vmmov 0   ;;  %vm199_vm1 = vcmask 64512  }
  0x15   : > { %1613 = vmatprep.subr.mxu0 %v1831_v2  ;;  %1618 = vmatprep.subr.mxu1 %v1831_v2  ;;  %vm346_vm2 = vcmask 130048   ;;  %vm502_vm3 = vcmask 261248   ;;  %p1754_p12 = scmp.ne.s32.totalorder %s2047_s15, %s1753_s24  ;;  %s1834_s12 = smov [#allocation2]  }
  0x16   : > { %1614 = vmatpush3.msra.mxu0 %v1910_v0  ;;  %1619 = vmatpush3.msra.mxu1 %v1915_v1  ;;  %s1579_s28 = sshll.u32 %s181_s27, 7  ;;  %s1757_s25 = sshll.u32 %s1834_s12, 4  ;;  %s1758_s25 = int_to_ptr.vmem [resolvable:$false] %s1757_s25 }
  0x17   : > { %1615 = vmatprep.mubr.msk.f32.mxu0 %vm1832_vm0, %v1831_v2  ;;  %1620 = vmatprep.mubr.msk.f32.mxu1 %vm1832_vm0, %v1831_v2  ;;  %s1932_s3 = scalar_lea.vmem %s2097_s0, %s1579_s28  ;;  %p1755_p13 = pnand %p1754_p12, %p1892_p4 }
  0x18   : > { %1623 = vmatprep.subr.mxu0 %v1831_v2  ;;  %1628 = vmatprep.subr.mxu1 %v1831_v2  ;;  %v1537_v3 = vld [vmem:[%s1932_s3 + $0x8] sm:$0xff]  ;;  %v196_v4 = vld [vmem:[%s1932_s3] sm:$0xff]  ;;  %v1541_v5 = vld [vmem:[%s1932_s3 + $0x18] sm:$0xff]  ;;  %s1759_s26 = scalar_lea.vmem %s1758_s25, 1024  ;;  %p1760_p1 = scmp.lt.s32.totalorder %s2047_s15, %s1758_s25 }
  0x19   : > { %1616 = vmatmul.mubr.msk.f32.vlgmr.msra.gmra.mxu0 %vm199_vm1, %v1537_v3  ;;  %1621 = vmatmul.mubr.msk.f32.vlgmr.msra.gmra.mxu1 %vm199_vm1, %v196_v4  ;;  %v1540_v6 = vld [vmem:[%s1932_s3 + $0x10] sm:$0xff]  ;;  %v1545_v7 = vld [vmem:[%s1932_s3 + $0x28] sm:$0xff]  ;;  %v1544_v8 = vld [vmem:[%s1932_s3 + $0x20] sm:$0xff]  ;;  %p1756_p0 = pneg %p1755_p13  ;;  %p1761_p2 = scmp.lt.s32.totalorder %s1759_s26, %s1753_s24 }
  0x1a   : > { %1624 = vmatpush3.msra.mxu0 %v1910_v0  ;;  %1629 = vmatpush3.msra.mxu1 %v1915_v1  ;;  %v1550_v9 = vld [vmem:[%s1932_s3 + $0x38] sm:$0xff]  ;;  %v1549_v10 = vld [vmem:[%s1932_s3 + $0x30] sm:$0xff]  ;;  %v1555_v11 = vld [vmem:[%s1932_s3 + $0x48] sm:$0xff] }
  0x1b   : > { %1625 = vmatprep.mubr.msk.f32.mxu0 %vm1832_vm0, %v1831_v2  ;;  %1630 = vmatprep.mubr.msk.f32.mxu1 %vm1832_vm0, %v1831_v2  ;;  %v1554_v12 = vld [vmem:[%s1932_s3 + $0x40] sm:$0xff]  ;;  %v1560_v13 = vld [vmem:[%s1932_s3 + $0x58] sm:$0xff]  ;;  %v1559_v14 = vld [vmem:[%s1932_s3 + $0x50] sm:$0xff]  ;;  %p1762_p3 = por %p1761_p2, %p1760_p1 }
  0x1c   : > { %1633 = vmatprep.subr.mxu0 %v1831_v2  ;;  %1638 = vmatprep.subr.mxu1 %v1831_v2  ;;  %v1565_v15 = vld [vmem:[%s1932_s3 + $0x68] sm:$0xff]  ;;  %v1564_v16 = vld [vmem:[%s1932_s3 + $0x60] sm:$0xff]  ;;  %v1570_v17 = vld [vmem:[%s1932_s3 + $0x78] sm:$0xff] }
  0x1d   : > { %1626 = vmatmul.mubr.msk.f32.vlgmr.msra.gmra.mxu0 %vm199_vm1, %v1541_v5  ;;  %1631 = vmatmul.mubr.msk.f32.vlgmr.msra.gmra.mxu1 %vm199_vm1, %v1540_v6  ;;  %v1569_v18 = vld [vmem:[%s1932_s3 + $0x70] sm:$0xff]  ;;  %p1763_p5 = pnand %p1762_p3, %p1756_p0 }
  0x1e   : > { %1634 = vmatpush3.msra.mxu0 %v1910_v0  ;;  %1639 = vmatpush3.msra.mxu1 %v1915_v1 }
  0x1f   : > { %1635 = vmatprep.mubr.msk.f32.mxu0 %vm1832_vm0, %v1831_v2  ;;  %1640 = vmatprep.mubr.msk.f32.mxu1 %vm1832_vm0, %v1831_v2 }
  0x20   : > { %1643 = vmatprep.subr.mxu0 %v1831_v2  ;;  %1648 = vmatprep.subr.mxu1 %v1831_v2 }
  0x21   : > { %1636 = vmatmul.mubr.msk.f32.vlgmr.msra.gmra.mxu0 %vm199_vm1, %v1545_v7  ;;  %1641 = vmatmul.mubr.msk.f32.vlgmr.msra.gmra.mxu1 %vm199_vm1, %v1544_v8 }
  0x22   : > { %1644 = vmatpush3.msra.mxu0 %v1910_v0  ;;  %1649 = vmatpush3.msra.mxu1 %v1915_v1 }
  0x23   : > { %1645 = vmatprep.mubr.msk.f32.mxu0 %vm1832_vm0, %v1831_v2  ;;  %1650 = vmatprep.mubr.msk.f32.mxu1 %vm1832_vm0, %v1831_v2 }
  0x24   : > { %1653 = vmatprep.subr.mxu0 %v1831_v2  ;;  %1658 = vmatprep.subr.mxu1 %v1831_v2 }
  0x25   : > { %1646 = vmatmul.mubr.msk.f32.vlgmr.msra.gmra.mxu0 %vm199_vm1, %v1550_v9  ;;  %1651 = vmatmul.mubr.msk.f32.vlgmr.msra.gmra.mxu1 %vm199_vm1, %v1549_v10 }
  0x26   : > { %1654 = vmatpush3.msra.mxu0 %v1910_v0  ;;  %1659 = vmatpush3.msra.mxu1 %v1915_v1 }
  0x27   : > { %1655 = vmatprep.mubr.msk.f32.mxu0 %vm1832_vm0, %v1831_v2  ;;  %1660 = vmatprep.mubr.msk.f32.mxu1 %vm1832_vm0, %v1831_v2 }
  0x28   : > { %1663 = vmatprep.subr.mxu0 %v1831_v2  ;;  %1668 = vmatprep.subr.mxu1 %v1831_v2 }
  0x29   : > { %1656 = vmatmul.mubr.msk.f32.vlgmr.msra.gmra.mxu0 %vm199_vm1, %v1555_v11  ;;  %1661 = vmatmul.mubr.msk.f32.vlgmr.msra.gmra.mxu1 %vm199_vm1, %v1554_v12 }
  0x2a   : > { %1664 = vmatpush3.msra.mxu0 %v1910_v0  ;;  %1669 = vmatpush3.msra.mxu1 %v1915_v1 }
  0x2b   : > { %1665 = vmatprep.mubr.msk.f32.mxu0 %vm1832_vm0, %v1831_v2  ;;  %1670 = vmatprep.mubr.msk.f32.mxu1 %vm1832_vm0, %v1831_v2 }
  0x2c   : > { %1673 = vmatprep.subr.mxu0 %v1831_v2  ;;  %1678 = vmatprep.subr.mxu1 %v1831_v2 }
  0x2d   : > { %1666 = vmatmul.mubr.msk.f32.vlgmr.msra.gmra.mxu0 %vm199_vm1, %v1560_v13  ;;  %1671 = vmatmul.mubr.msk.f32.vlgmr.msra.gmra.mxu1 %vm199_vm1, %v1559_v14 }
  0x2e   : > { %1674 = vmatpush3.msra.mxu0 %v1910_v0  ;;  %1679 = vmatpush3.msra.mxu1 %v1915_v1 }
  0x2f   : > { %1675 = vmatprep.mubr.msk.f32.mxu0 %vm1832_vm0, %v1831_v2  ;;  %1680 = vmatprep.mubr.msk.f32.mxu1 %vm1832_vm0, %v1831_v2 }
  0x30   : > { %1683 = vmatprep.subr.mxu0 %v1831_v2  ;;  %1688 = vmatprep.subr.mxu1 %v1831_v2 }
  0x31   : > { %1676 = vmatmul.mubr.msk.f32.vlgmr.msra.gmra.mxu0 %vm199_vm1, %v1565_v15  ;;  %1681 = vmatmul.mubr.msk.f32.vlgmr.msra.gmra.mxu1 %vm199_vm1, %v1564_v16 }
  0x32   : > { %1684 = vmatpush3.msra.mxu0 %v1910_v0  ;;  %1689 = vmatpush3.msra.mxu1 %v1915_v1 }
  0x33   : > { %1685 = vmatprep.mubr.msk.f32.mxu0 %vm1832_vm0, %v1831_v2  ;;  %1690 = vmatprep.mubr.msk.f32.mxu1 %vm1832_vm0, %v1831_v2 }
  0x35   : > { %1686 = vmatmul.mubr.msk.f32.vlgmr.msra.gmra.mxu0 %vm199_vm1, %v1570_v17  ;;  %1691 = vmatmul.mubr.msk.f32.vlgmr.msra.gmra.mxu1 %vm199_vm1, %v1569_v18 }
  0xd9   : > { %v269_v19 = vpop.f32.mrf.mxu0  ;;  %v342_v20 = vpop.f32.mrf.mxu1 }
  0xda   : > { %v343_v21 = vadd.f32 %v342_v20, %v269_v19 }
  0xdb   : > { %v1617_v22 = vpop.f32.mrf.mxu0  ;;  %v1622_v23 = vpop.f32.mrf.mxu1 }
  0xdc   : > { %347 = vst.msk [vmem:[%s2023_s6] sm:$0xff] %vm346_vm2, %v343_v21 }
  0xdd   : > { %v421_v24 = vpop.f32.mrf.mxu0  ;;  %v494_v25 = vpop.f32.mrf.mxu1 }
  0xde   : > { %v495_v26 = vadd.f32 %v494_v25, %v421_v24 }
  0xdf   : > { %v1627_v27 = vpop.f32.mrf.mxu0  ;;  %v1632_v28 = vpop.f32.mrf.mxu1 }
  0xe0   : > { %499 = vrot.lane.b32.xlu0 %v495_v26, %s1833_s7 }
  0xe1   : > { %v577_v29 = vpop.f32.mrf.mxu0  ;;  %v650_v30 = vpop.f32.mrf.mxu1 }
  0xe2   : > { %v651_v31 = vadd.f32 %v650_v30, %v577_v29 }
  0xe3   : > { %v1637_v32 = vpop.f32.mrf.mxu0  ;;  %v1642_v33 = vpop.f32.mrf.mxu1 }
  0xe4   : > { %1548 = vst.msk [vmem:[%s2023_s6 + $0x8] sm:$0xff] %vm346_vm2, %v651_v31 }
  0xe5   : > { %v729_v34 = vpop.f32.mrf.mxu0  ;;  %v802_v35 = vpop.f32.mrf.mxu1 }
  0xe6   : > { %v803_v36 = vadd.f32 %v802_v35, %v729_v34 }
  0xe7   : > { %v1647_v37 = vpop.f32.mrf.mxu0  ;;  %v1652_v38 = vpop.f32.mrf.mxu1 }
  0xe8   : > { %807 = vrot.lane.b32.xlu0 %v803_v36, %s1833_s7 }
  0xe9   : > { %v884_v39 = vpop.f32.mrf.mxu0  ;;  %v957_v40 = vpop.f32.mrf.mxu1 }
  0xea   : > { %v958_v41 = vadd.f32 %v957_v40, %v884_v39 }
  0xeb   : > { %v1657_v42 = vpop.f32.mrf.mxu0  ;;  %v1662_v43 = vpop.f32.mrf.mxu1 }
  0xec   : > { %1558 = vst.msk [vmem:[%s2023_s6 + $0x10] sm:$0xff] %vm346_vm2, %v958_v41 }
  0xed   : > { %v1036_v44 = vpop.f32.mrf.mxu0  ;;  %v1109_v45 = vpop.f32.mrf.mxu1 }
  0xee   : > { %v1110_v46 = vadd.f32 %v1109_v45, %v1036_v44 }
  0xef   : > { %v1667_v47 = vpop.f32.mrf.mxu0  ;;  %v1672_v48 = vpop.f32.mrf.mxu1 }
  0xf0   : > { %1114 = vrot.lane.b32.xlu1 %v1110_v46, %s1833_s7 }
  0xf1   : > { %v1191_v49 = vpop.f32.mrf.mxu0  ;;  %v1264_v50 = vpop.f32.mrf.mxu1 }
  0xf2   : > { %v1265_v51 = vadd.f32 %v1264_v50, %v1191_v49 }
  0xf3   : > { %v1677_v52 = vpop.f32.mrf.mxu0  ;;  %v1682_v53 = vpop.f32.mrf.mxu1 }
  0xf4   : > { %1568 = vst.msk [vmem:[%s2023_s6 + $0x18] sm:$0xff] %vm346_vm2, %v1265_v51 }
  0xf5   : > { %v1343_v54 = vpop.f32.mrf.mxu0  ;;  %v1416_v55 = vpop.f32.mrf.mxu1 }
  0xf6   : > { %v1417_v56 = vadd.f32 %v1416_v55, %v1343_v54 }
  0xf7   : > { %v1687_v57 = vpop.f32.mrf.mxu0  ;;  %v1692_v58 = vpop.f32.mrf.mxu1 }
  0xf8   : > { %1421 = vrot.lane.b32.xlu1 %v1417_v56, %s1833_s7 }
 0x152   : > { %v500_v59 = vpop.permute.xlu0 %499 }
 0x153   : > { %503 = vst.msk [vmem:[%s2023_s6] sm:$0xff] %vm502_vm3, %v500_v59 }
 0x15a   : > { %v808_v60 = vpop.permute.xlu0 %807 }
 0x15b   : > { %1553 = vst.msk [vmem:[%s2023_s6 + $0x8] sm:$0xff] %vm502_vm3, %v808_v60 }
 0x162   : > { %v1115_v61 = vpop.permute.xlu1 %1114 }
 0x163   : > { %1563 = vst.msk [vmem:[%s2023_s6 + $0x10] sm:$0xff] %vm502_vm3, %v1115_v61 }
 0x16a   : > { %v1422_v62 = vpop.permute.xlu1 %1421 }
 0x16b   : > { %1573 = vst.msk [vmem:[%s2023_s6 + $0x18] sm:$0xff] %vm502_vm3, %v1422_v62 }
 0x16c   : > { %1766 = shalt.err (!%p1763_p5)
}
 0x16d   : > { %s1767_s27 = scalar_lea.hbm %s2045_s20, 512  ;;  %s1771_s30 = scalar_lea.hbm %s2099_s2, 1024 }
 0x16e   : > { %p1768_p6 = scmp.ne.s32.totalorder %s2045_s20, %s1767_s27  ;;  %p1772_p10 = scmp.lt.s32.totalorder %s2045_s20, %s2099_s2 }
 0x16f   : > { %p1773_p11 = scmp.lt.s32.totalorder %s1771_s30, %s1767_s27 }
 0x170   : > { %p1769_p7 = pnand %p1768_p6, %p1892_p4 }
 0x171   : > { %p1774_p12 = por %p1773_p11, %p1772_p10 }
 0x172   : > { %p1770_p9 = pneg %p1769_p7 }
 0x174   : > { %p1775_p13 = pnand %p1774_p12, %p1770_p9 }
 0x176   : > { %1778 = shalt.err (!%p1775_p13)
}
 0x177   : > { %s1835_s5 = smov 128   ;;  %s1836_s6 = smov 8  }
 0x178   : > { %1693 = dma.vmem_to_hbm [thread:$0]  (%p1892_p4), %s2047_s15, 512, %s2045_s20, %s2052_s23, %s1835_s5, %s1835_s5, %s1836_s6  }
 0x179 PF: > { %p1699_p0 = scmp.ge.s32.totalorder %s1829_s14, 2  ;;  %s1457_s7 = sand.u32 1, %s1809_s9  }
 0x17a   : > { %s1458_s8 = scalar_lea.sflag [#allocation3], %s1457_s7 }
 0x17b   : > { %p1696_p1 = pnand %p1699_p0, %p1899_p8 }
 0x17d   : > { %p1697_p2 = pneg %p1696_p1 }
 0x17f   : > { %1804 = dma.done.wait (%p1697_p2), %s1458_s8, 512  }
 0x180   : > { %1806 = vsyncadd (%p1697_p2), %s1458_s8, 4294966784  ;;  %s15_s14 = sadd.s32 1, %s1829_s14   ;;  %s2102_s9 = smov %s1813_s10 }
 0x181   : > { %p12_p3 = scmp.ge.s32.totalorder %s15_s14, 4   ;;  %s2103_s10 = smov %s1817_s11 }
 0x182   : > { %s2104_s11 = smov %s1905_s22  ;;  %s2105_s12 = smov %s1825_s13 }
 0x183   : > { %s2106_s13 = smov %s2108_s17  ;;  %14 = sbr.rel (!%p12_p3) target bundleno = 4 (0x4), region = 82 }
 0x188   :  { %1463 = vsyncpa [#allocation3], 1 }
 0x189   :  { %1465 = vsyncpa [#allocation3 + $0x1], 1 }

</bundles_post_ra>
